<compile_context>
chip_gen: v5e
topology: v5e:2x2
jax: 0.10.0
libtpu: 0.0.40
codegen_flags: <defaults>
</compile_context>

<pallas_src>
import functools

import jax
import jax.numpy as jnp
from jax.experimental import pallas as pl
from jax.experimental.pallas import tpu as pltpu


def _round_up(x, m):
    return ((x + m - 1) // m) * m


def mlp_kernel(x_ref, w1_ref, b1_ref, w2_ref, b2_ref, wst_ref, bst_ref,
               s_ref, t_ref):
    cd = w1_ref.dtype  # compute dtype (bf16 weights)

    # fc1 + ReLU. x is cast in-kernel (saves a full wrapper-side HBM read+write
    # pass over x); MXU accumulates in f32.
    h = jnp.dot(x_ref[...].astype(cd), w1_ref[...],
                preferred_element_type=jnp.float32)
    h = jnp.maximum(h + b1_ref[...], 0.0)

    # fc2 + ReLU
    h = jnp.dot(h.astype(cd), w2_ref[...], preferred_element_type=jnp.float32)
    h = jnp.maximum(h + b2_ref[...], 0.0)

    # Fused heads: one matmul against [ws | wt], then split lanes into the two
    # outputs. tanh only touches the s half.
    st = jnp.dot(h.astype(cd), wst_ref[...], preferred_element_type=jnp.float32)
    st = st + bst_ref[...]
    n_out = s_ref.shape[-1]
    s_ref[...] = jnp.tanh(st[:, :n_out]).astype(s_ref.dtype)
    t_ref[...] = st[:, n_out:].astype(t_ref.dtype)


@functools.partial(jax.jit, static_argnames=("tb",))
def mlp_forward(x, params, *, tb=4096):
    """x: [B, n_input] (any float dtype). Returns (s, t), each [B, n_output] f32."""
    B, n_input = x.shape
    n_hidden = params["w1"].shape[1]
    n_output = params["w_st"].shape[1] // 2

    # Batch tiling: byte-budget-driven tile (tb rows by default), but never larger
    # than the (sublane-rounded) batch, so small batches are a single grid step.
    TB = min(_round_up(tb, 8), _round_up(B, 8))
    Bp = _round_up(B, TB)
    if Bp != B:
        # Only taken for ragged batches; common case (B multiple of TB) has no pad.
        x = jnp.pad(x, ((0, Bp - B), (0, 0)))
    grid = (Bp // TB,)

    def batch_map(i):            # x / outputs: blocked along batch
        return (i, 0)

    def const_map(i):            # weights / biases: resident across grid steps
        return (0, 0)

    resident = pl.Buffered(1)    # single-buffer the grid-invariant operands

    in_specs = [
        pl.BlockSpec((TB, n_input), batch_map),
        pl.BlockSpec(params["w1"].shape, const_map, pipeline_mode=resident),
        pl.BlockSpec(params["b1"].shape, const_map, pipeline_mode=resident),
        pl.BlockSpec(params["w2"].shape, const_map, pipeline_mode=resident),
        pl.BlockSpec(params["b2"].shape, const_map, pipeline_mode=resident),
        pl.BlockSpec(params["w_st"].shape, const_map, pipeline_mode=resident),
        pl.BlockSpec(params["b_st"].shape, const_map, pipeline_mode=resident),
    ]
    out_specs = [
        pl.BlockSpec((TB, n_output), batch_map),
        pl.BlockSpec((TB, n_output), batch_map),
    ]
    out_shape = (
        jax.ShapeDtypeStruct((Bp, n_output), jnp.float32),
        jax.ShapeDtypeStruct((Bp, n_output), jnp.float32),
    )

    # Explicit VMEM budget: actual footprint x2 headroom, floored at 16 MiB and
    # capped at 64 MiB (v7x per-TC physical).
    w_bytes = sum(int(params[k].size) * params[k].dtype.itemsize
                  for k in ("w1", "w2", "w_st"))
    b_bytes = sum(int(params[k].size) * params[k].dtype.itemsize
                  for k in ("b1", "b2", "b_st"))
    act_bytes = (2 * TB * n_input * x.dtype.itemsize      # x tile, double-buffered
                 + 2 * 2 * TB * n_output * 4              # s/t tiles, double-buffered
                 + 4 * TB * n_hidden * 4)                 # fc1/fc2 activation slack
    vmem_limit = int(min(max(2 * (w_bytes + b_bytes + act_bytes) + (4 << 20),
                             16 << 20),
                         64 << 20))

    s, t = pl.pallas_call(
        mlp_kernel,
        out_shape=out_shape,
        grid=grid,
        in_specs=in_specs,
        out_specs=out_specs,
        compiler_params=pltpu.CompilerParams(
            dimension_semantics=("parallel",),
            vmem_limit_bytes=vmem_limit),
    )(x, params["w1"], params["b1"], params["w2"], params["b2"],
      params["w_st"], params["b_st"])

    if Bp != B:
        s = s[:B]
        t = t[:B]
    return s, t


def init_params(key, n_input, n_output, n_hidden, weight_dtype=jnp.bfloat16):
    """Deterministic synthetic init (PyTorch-like uniform fan-in bounds).

    Weights stored [in, out] in `weight_dtype` (bf16), biases [1, out] f32.
    The fused head weight/bias (w_st, b_st) is built once here, not per call.
    """
    ks = jax.random.split(key, 8)

    def lin(kw, kb, fan_in, fan_out):
        bound = 1.0 / (fan_in ** 0.5)
        w = jax.random.uniform(kw, (fan_in, fan_out), jnp.float32,
                               -bound, bound).astype(weight_dtype)
        b = jax.random.uniform(kb, (1, fan_out), jnp.float32, -bound, bound)
        return w, b

    w1, b1 = lin(ks[0], ks[1], n_input, n_hidden)
    w2, b2 = lin(ks[2], ks[3], n_hidden, n_hidden)
    ws, bs = lin(ks[4], ks[5], n_hidden, n_output)
    wt, bt = lin(ks[6], ks[7], n_hidden, n_output)
    w_st = jnp.concatenate([ws, wt], axis=1)   # hoisted head fusion
    b_st = jnp.concatenate([bs, bt], axis=1)
    return dict(w1=w1, b1=b1, w2=w2, b2=b2,
                ws=ws, bs=bs, wt=wt, bt=bt,
                w_st=w_st, b_st=b_st)


def mlp_ref(x, p):
    """Pure-JAX reference with the same bf16-weight / f32-accumulate numerics."""
    cd = p["w1"].dtype
    h = jnp.maximum(
        jnp.dot(x.astype(cd), p["w1"], preferred_element_type=jnp.float32)
        + p["b1"], 0.0)
    h = jnp.maximum(
        jnp.dot(h.astype(cd), p["w2"], preferred_element_type=jnp.float32)
        + p["b2"], 0.0)
    s = jnp.tanh(
        jnp.dot(h.astype(cd), p["ws"], preferred_element_type=jnp.float32)
        + p["bs"])
    t = (jnp.dot(h.astype(cd), p["wt"], preferred_element_type=jnp.float32)
         + p["bt"])
    return s, t


if __name__ == "__main__":
    key = jax.random.PRNGKey(0)
    kx, kp = jax.random.split(key)

    n_input, n_output, n_hidden = 4, 2, 32
    params = init_params(kp, n_input, n_output, n_hidden)

    # Case 1: small batch, single grid step, no padding, no wrapper slices.
    x1 = jax.random.normal(kx, (8, n_input), jnp.float32)
    s1, t1 = mlp_forward(x1, params)
    jax.block_until_ready((s1, t1))
    s1_r, t1_r = mlp_ref(x1, params)
    assert s1.shape == (8, n_output) and t1.shape == (8, n_output)
    assert jnp.allclose(s1, s1_r, atol=2e-2, rtol=2e-2), "s mismatch (case 1)"
    assert jnp.allclose(t1, t1_r, atol=2e-2, rtol=2e-2), "t mismatch (case 1)"

    # Case 2: multi-step batch grid (TB | B -> no pad, no slice); exercises the
    # resident-weight pipeline across grid steps.
    x2 = jax.random.normal(kx, (48, n_input), jnp.float32)
    s2, t2 = mlp_forward(x2, params, tb=16)      # TB=16, grid=(3,)
    jax.block_until_ready((s2, t2))
    s2_r, t2_r = mlp_ref(x2, params)
    assert s2.shape == (48, n_output) and t2.shape == (48, n_output)
    assert jnp.allclose(s2, s2_r, atol=2e-2, rtol=2e-2), "s mismatch (case 2)"
    assert jnp.allclose(t2, t2_r, atol=2e-2, rtol=2e-2), "t mismatch (case 2)"

    # Case 3: ragged batch (B not a multiple of 8) -> conditional pad + slice path.
    x3 = jax.random.normal(kx, (20, n_input), jnp.float32)
    s3, t3 = mlp_forward(x3, params)             # TB=24, grid=(1,)
    jax.block_until_ready((s3, t3))
    s3_r, t3_r = mlp_ref(x3, params)
    assert s3.shape == (20, n_output) and t3.shape == (20, n_output)
    assert jnp.allclose(s3, s3_r, atol=2e-2, rtol=2e-2), "s mismatch (case 3)"
    assert jnp.allclose(t3, t3_r, atol=2e-2, rtol=2e-2), "t mismatch (case 3)"

    print("KERNEL_OK")
</pallas_src>

<mosaic_0001>
module attributes {stable_mosaic.version = 11 : i64} {
  func.func @mlp_kernel(%arg0: i32, %arg1: memref<8x4xf32, #tpu.memory_space<vmem>>, %arg2: memref<4x32xbf16, #tpu.memory_space<vmem>>, %arg3: memref<1x32xf32, #tpu.memory_space<vmem>>, %arg4: memref<32x32xbf16, #tpu.memory_space<vmem>>, %arg5: memref<1x32xf32, #tpu.memory_space<vmem>>, %arg6: memref<32x4xbf16, #tpu.memory_space<vmem>>, %arg7: memref<1x4xf32, #tpu.memory_space<vmem>>, %arg8: memref<8x2xf32, #tpu.memory_space<vmem>>, %arg9: memref<8x2xf32, #tpu.memory_space<vmem>>) attributes {dimension_semantics = [#tpu.dimension_semantics<parallel>], iteration_bounds = array<i64: 1>, scalar_prefetch = 0 : i64, scratch_operands = 0 : i64, tpu.core_type = #tpu.core_type<tc>, window_params = [{transform_indices = @transform_0, window_bounds = array<i64: 8, 4>}, {pipeline_mode = #tpu.pipeline_mode<synchronous>, transform_indices = @transform_1, window_bounds = array<i64: 4, 32>}, {pipeline_mode = #tpu.pipeline_mode<synchronous>, transform_indices = @transform_2, window_bounds = array<i64: 1, 32>}, {pipeline_mode = #tpu.pipeline_mode<synchronous>, transform_indices = @transform_3, window_bounds = array<i64: 32, 32>}, {pipeline_mode = #tpu.pipeline_mode<synchronous>, transform_indices = @transform_4, window_bounds = array<i64: 1, 32>}, {pipeline_mode = #tpu.pipeline_mode<synchronous>, transform_indices = @transform_5, window_bounds = array<i64: 32, 4>}, {pipeline_mode = #tpu.pipeline_mode<synchronous>, transform_indices = @transform_6, window_bounds = array<i64: 1, 4>}, {transform_indices = @transform_7, window_bounds = array<i64: 8, 2>}, {transform_indices = @transform_8, window_bounds = array<i64: 8, 2>}]} {
    %c0 = arith.constant 0 : index
    %c0_0 = arith.constant 0 : index
    %0 = vector.load %arg1[%c0, %c0_0] : memref<8x4xf32, #tpu.memory_space<vmem>>, vector<8x4xf32>
    %1 = arith.truncf %0 : vector<8x4xf32> to vector<8x4xbf16>
    %c0_1 = arith.constant 0 : index
    %c0_2 = arith.constant 0 : index
    %2 = vector.load %arg2[%c0_1, %c0_2] : memref<4x32xbf16, #tpu.memory_space<vmem>>, vector<4x32xbf16>
    %cst = arith.constant dense<0.000000e+00> : vector<8x32xf32>
    %3 = tpu.matmul %1, %2, %cst {dimension_numbers = #tpu.dot_dimension_numbers<[1], [0], [0], [1], [0, 0, 1, 1], [], []>} : vector<8x4xbf16>, vector<4x32xbf16>, vector<8x32xf32> -> vector<8x32xf32>
    %c0_3 = arith.constant 0 : index
    %c0_4 = arith.constant 0 : index
    %4 = vector.load %arg3[%c0_3, %c0_4] : memref<1x32xf32, #tpu.memory_space<vmem>>, vector<1x32xf32>
    %5 = vector.broadcast %4 : vector<1x32xf32> to vector<8x32xf32>
    %6 = arith.addf %3, %5 : vector<8x32xf32>
    %cst_5 = arith.constant 0.000000e+00 : f32
    %7 = vector.broadcast %cst_5 : f32 to vector<8x32xf32>
    %8 = arith.maximumf %6, %7 : vector<8x32xf32>
    %9 = arith.truncf %8 : vector<8x32xf32> to vector<8x32xbf16>
    %c0_6 = arith.constant 0 : index
    %c0_7 = arith.constant 0 : index
    %10 = vector.load %arg4[%c0_6, %c0_7] : memref<32x32xbf16, #tpu.memory_space<vmem>>, vector<32x32xbf16>
    %cst_8 = arith.constant dense<0.000000e+00> : vector<8x32xf32>
    %11 = tpu.matmul %9, %10, %cst_8 {dimension_numbers = #tpu.dot_dimension_numbers<[1], [0], [0], [1], [0, 0, 1, 1], [], []>} : vector<8x32xbf16>, vector<32x32xbf16>, vector<8x32xf32> -> vector<8x32xf32>
    %c0_9 = arith.constant 0 : index
    %c0_10 = arith.constant 0 : index
    %12 = vector.load %arg5[%c0_9, %c0_10] : memref<1x32xf32, #tpu.memory_space<vmem>>, vector<1x32xf32>
    %13 = vector.broadcast %12 : vector<1x32xf32> to vector<8x32xf32>
    %14 = arith.addf %11, %13 : vector<8x32xf32>
    %cst_11 = arith.constant 0.000000e+00 : f32
    %15 = vector.broadcast %cst_11 : f32 to vector<8x32xf32>
    %16 = arith.maximumf %14, %15 : vector<8x32xf32>
    %17 = arith.truncf %16 : vector<8x32xf32> to vector<8x32xbf16>
    %c0_12 = arith.constant 0 : index
    %c0_13 = arith.constant 0 : index
    %18 = vector.load %arg6[%c0_12, %c0_13] : memref<32x4xbf16, #tpu.memory_space<vmem>>, vector<32x4xbf16>
    %cst_14 = arith.constant dense<0.000000e+00> : vector<8x4xf32>
    %19 = tpu.matmul %17, %18, %cst_14 {dimension_numbers = #tpu.dot_dimension_numbers<[1], [0], [0], [1], [0, 0, 1, 1], [], []>} : vector<8x32xbf16>, vector<32x4xbf16>, vector<8x4xf32> -> vector<8x4xf32>
    %c0_15 = arith.constant 0 : index
    %c0_16 = arith.constant 0 : index
    %20 = vector.load %arg7[%c0_15, %c0_16] : memref<1x4xf32, #tpu.memory_space<vmem>>, vector<1x4xf32>
    %21 = vector.broadcast %20 : vector<1x4xf32> to vector<8x4xf32>
    %22 = arith.addf %19, %21 : vector<8x4xf32>
    %23 = vector.extract_strided_slice %22 {offsets = [0, 0], sizes = [8, 2], strides = [1, 1]} : vector<8x4xf32> to vector<8x2xf32>
    %24 = math.tanh %23 : vector<8x2xf32>
    %c0_17 = arith.constant 0 : index
    %c0_18 = arith.constant 0 : index
    %25 = vector.load %arg8[%c0_17, %c0_18] : memref<8x2xf32, #tpu.memory_space<vmem>>, vector<8x2xf32>
    tpu.vector_store %arg8[%c0_17, %c0_18], %24 {strides = array<i32>} : memref<8x2xf32, #tpu.memory_space<vmem>>, vector<8x2xf32>,
    %26 = vector.extract_strided_slice %22 {offsets = [0, 2], sizes = [8, 2], strides = [1, 1]} : vector<8x4xf32> to vector<8x2xf32>
    %c0_19 = arith.constant 0 : index
    %c0_20 = arith.constant 0 : index
    %27 = vector.load %arg9[%c0_19, %c0_20] : memref<8x2xf32, #tpu.memory_space<vmem>>, vector<8x2xf32>
    tpu.vector_store %arg9[%c0_19, %c0_20], %26 {strides = array<i32>} : memref<8x2xf32, #tpu.memory_space<vmem>>, vector<8x2xf32>,
    return
  }
  func.func @transform_0(%arg0: i32) -> (i32, i32) {
    %c0_i32 = arith.constant 0 : i32
    %c0_i32_0 = arith.constant 0 : i32
    return %arg0, %c0_i32 : i32, i32
  }
  func.func @transform_1(%arg0: i32) -> (i32, i32) {
    %c0_i32 = arith.constant 0 : i32
    %c0_i32_0 = arith.constant 0 : i32
    %c0_i32_1 = arith.constant 0 : i32
    return %c0_i32, %c0_i32_0 : i32, i32
  }
  func.func @transform_2(%arg0: i32) -> (i32, i32) {
    %c0_i32 = arith.constant 0 : i32
    %c0_i32_0 = arith.constant 0 : i32
    %c0_i32_1 = arith.constant 0 : i32
    return %c0_i32, %c0_i32_0 : i32, i32
  }
  func.func @transform_3(%arg0: i32) -> (i32, i32) {
    %c0_i32 = arith.constant 0 : i32
    %c0_i32_0 = arith.constant 0 : i32
    %c0_i32_1 = arith.constant 0 : i32
    return %c0_i32, %c0_i32_0 : i32, i32
  }
  func.func @transform_4(%arg0: i32) -> (i32, i32) {
    %c0_i32 = arith.constant 0 : i32
    %c0_i32_0 = arith.constant 0 : i32
    %c0_i32_1 = arith.constant 0 : i32
    return %c0_i32, %c0_i32_0 : i32, i32
  }
  func.func @transform_5(%arg0: i32) -> (i32, i32) {
    %c0_i32 = arith.constant 0 : i32
    %c0_i32_0 = arith.constant 0 : i32
    %c0_i32_1 = arith.constant 0 : i32
    return %c0_i32, %c0_i32_0 : i32, i32
  }
  func.func @transform_6(%arg0: i32) -> (i32, i32) {
    %c0_i32 = arith.constant 0 : i32
    %c0_i32_0 = arith.constant 0 : i32
    %c0_i32_1 = arith.constant 0 : i32
    return %c0_i32, %c0_i32_0 : i32, i32
  }
  func.func @transform_7(%arg0: i32) -> (i32, i32) {
    %c0_i32 = arith.constant 0 : i32
    %c0_i32_0 = arith.constant 0 : i32
    return %arg0, %c0_i32 : i32, i32
  }
  func.func @transform_8(%arg0: i32) -> (i32, i32) {
    %c0_i32 = arith.constant 0 : i32
    %c0_i32_0 = arith.constant 0 : i32
    return %arg0, %c0_i32 : i32, i32
  }
}

</mosaic_0001>

<bundles_post_ra>
// kernel: mlp_forward.1
= control target key start
LH: loop header
LB: loop body
LE: loop exit
PB: predicated region body
PF: predicated region fallthrough
CT: control target
= control target key end

     0   :  { %vm40_vm0 = vcmask 1041408   ;;  %vm36_vm1 = vcmask 31744   ;;  %vm79_vm2 = vcmask 261120   ;;  %s179_s19 = smov 126   ;;  %vm135_vm3 = vcmask 15360   ;;  %s258_s1 = inlined_call_operand.vmem [shape: bf16[4,32], index: 1, kind: input, shape index: {}]   ;;  %s259_s0 = inlined_call_operand.vmem [shape: f32[8,4], index: 0, kind: input, shape index: {}]   ;;  %s260_s2 = inlined_call_operand.vmem [shape: f32[1,32], index: 2, kind: input, shape index: {}]   ;;  %s261_s4 = inlined_call_operand.vmem [shape: f32[1,32], index: 4, kind: input, shape index: {}]   ;;  %s262_s3 = inlined_call_operand.vmem [shape: bf16[32,32], index: 3, kind: input, shape index: {}]   ;;  %s263_s6 = inlined_call_operand.vmem [shape: f32[1,4], index: 6, kind: input, shape index: {}]   ;;  %s264_s5 = inlined_call_operand.vmem [shape: bf16[32,4], index: 5, kind: input, shape index: {}]   ;;  %s265_s7 = inlined_call_operand.vmem [shape: f32[8,2], index: 7, kind: output, shape index: {0}]   ;;  %s266_s8 = inlined_call_operand.vmem [shape: f32[8,2], index: 8, kind: output, shape index: {1}]  }
   0x1   :  { %v31_v0 = vld [vmem:[%s258_s1] sm:$0x3]  ;;  %v170_v4 = vld [vmem:[%s262_s3 + $0x8] sm:$0xff] }
   0x2   :  { %v29_v1 = vld [vmem:[%s259_s0] sm:$0xff]  ;;  %v42_v2 = vsel %vm40_vm0, %v31_v0, 0  ;;  %89 = vmatpush.bf16.msra.mxu1 %v170_v4  ;;  %v172_v12 = vld [vmem:[%s264_s5 + $0x8] sm:$0xff] }
   0x3   :  { %v30_v3 = vpack.c.bf16 %v29_v1, %v29_v1  ;;  %51 = vmatpush.bf16.msra.mxu0 %v42_v2  ;;  %v169_v5 = vld [vmem:[%s262_s3] sm:$0xff]  ;;  %127 = vmatpush.bf16.msra.mxu2 %v172_v12 }
   0x4   :  { %v174_v6 = vld [vmem:[%s260_s2] ss:$0 sm:$0xff] }
   0x5   :  { %v171_v13 = vld [vmem:[%s264_s5] sm:$0xff] }
   0x6   :  { %150 = vmatmul.msk.bf16.vlgmr.msra.gmra.mxu0 %vm36_vm1, %v30_v3  ;;  %90 = vmatpush.bf16.msra.mxu1 %v169_v5  ;;  %v175_v14 = vld [vmem:[%s261_s4] ss:$0 sm:$0xff] }
   0x7   :  { %128 = vmatpush.bf16.msra.mxu2 %v171_v13  ;;  %v176_v20 = vld [vmem:[%s263_s6] ss:$0 sm:$0xff] }
  0x83   :  { %v53_v7 = vpop.f32.mrf.mxu0 }
  0x84   :  { %v54_v8 = vadd.f32 %v174_v6, %v53_v7 }
  0x86   :  { %v57_v9 = vmax.f32 %v54_v8, 0.0 }
  0x88   :  { %v58_v10 = vpack.c.bf16 %v57_v9, %v57_v9 }
  0x8a   :  { %159 = vmatmul.msk.bf16.vlgmr.msra.gmra.mxu1 %vm79_vm2, %v58_v10 }
  0x8b   :  { %v55_v11 = vpop.f32.mrf.mxu0 }
 0x107   :  { %v92_v15 = vpop.f32.mrf.mxu1 }
 0x108   :  { %v93_v16 = vadd.f32 %v175_v14, %v92_v15 }
 0x10a   :  { %v96_v17 = vmax.f32 %v93_v16, 0.0 }
 0x10c   :  { %v97_v18 = vpack.c.bf16 %v96_v17, %v96_v17 }
 0x10e   :  { %168 = vmatmul.msk.bf16.vlgmr.msra.gmra.mxu2 %vm79_vm2, %v97_v18 }
 0x10f   :  { %v94_v19 = vpop.f32.mrf.mxu1 }
 0x191   :  { %v130_v21 = vpop.f32.mrf.mxu2 }
 0x192   :  { %v131_v22 = vadd.f32 %v176_v20, %v130_v21 }
 0x194   :  { %177 = vtanh.f32 %v131_v22  ;;  %138 = vrot.lane.b32.xlu0 %v131_v22, %s179_s19 }
 0x199   :  { %v132_v23 = vpop.f32.mrf.mxu2 }
 0x19a   :  { %v178_v24 = vpop.eup %177 }
 0x19b   :  { %136 = vst.msk [vmem:[%s265_s7] sm:$0xff] %vm135_vm3, %v178_v24 }
 0x206   :  { %v139_v25 = vpop.permute.xlu0 %138 }
 0x207   :  { %141 = vst.msk [vmem:[%s266_s8] sm:$0xff] %vm135_vm3, %v139_v25 }

</bundles_post_ra>
